<compile_context>
chip_gen: v6e
topology: v6e:2x2x1
jax: 0.10.0
libtpu: 0.0.40
codegen_flags: <defaults>
</compile_context>

<pallas_src>
import jax
import jax.numpy as jnp
from jax.experimental import pallas as pl
from jax.experimental.pallas import tpu as pltpu


def _round_up(x, m):
    return ((x + m - 1) // m) * m


def _cdiv(a, b):
    return -(-a // b)


# ----------------------------------------------------------------------------
# Per-generation defaults
# ----------------------------------------------------------------------------
def _tpu_defaults():
    """Pick tile defaults from the chip's VMEM capacity / device kind."""
    vmem_cap = 128 << 20
    try:
        vmem_cap = int(pltpu.get_tpu_info().vmem_capacity_bytes)
    except Exception:
        pass
    kind = ""
    try:
        kind = jax.devices()[0].device_kind.lower()
    except Exception:
        pass

    if vmem_cap <= (64 << 20):
        # v7x-class: 64 MiB VMEM per TensorCore -> smaller I tile, single-buffer x.
        return dict(tm=512, ti_cap=256, vmem_cap=vmem_cap, single_buffer_x=True)
    if "v5e" in kind or "v5 lite" in kind or "v5litepod" in kind:
        # v5e: compute-bound threshold is much lower; don't burn VMEM on huge tm.
        return dict(tm=384, ti_cap=512, vmem_cap=vmem_cap, single_buffer_x=False)
    # v6e / default 128 MiB parts.
    return dict(tm=512, ti_cap=512, vmem_cap=vmem_cap, single_buffer_x=False)


def _pick_ti(I, ti_cap):
    """Choose ti so I rounds up with minimal zero padding (lane-aligned)."""
    ti_cap = max(128, int(ti_cap))
    n_i = max(1, _cdiv(I, ti_cap))
    return max(128, _round_up(_cdiv(I, n_i), 128))


# ----------------------------------------------------------------------------
# Kernel
# ----------------------------------------------------------------------------
def _gated_mlp_kernel(x_ref, w_gu_ref, w_proj_ref, o_ref, acc_ref):
    # x_ref:      (tm, E)     compute dtype
    # w_gu_ref:   (E, 2*ti)   fused [gate | up] columns for intermediate tile j
    # w_proj_ref: (ti, E)     compute dtype
    # o_ref:      (tm, E)     output dtype
    # acc_ref:    (tm, E)     f32 accumulator, resident across the I axis
    j = pl.program_id(1)

    @pl.when(j == 0)
    def _():
        acc_ref[...] = jnp.zeros_like(acc_ref)

    # One fused MXU contraction produces both halves of the gated unit.
    h = jnp.dot(x_ref[...], w_gu_ref[...], preferred_element_type=jnp.float32)
    ti = h.shape[-1] // 2
    x1 = h[:, :ti]                             # gate (SiLU input), f32
    x2 = h[:, ti:]                             # up, f32
    gated = (x1 * jax.nn.sigmoid(x1)) * x2     # gate math kept in f32 (VPU + EUP)

    acc_ref[...] += jnp.dot(gated.astype(w_proj_ref.dtype), w_proj_ref[...],
                            preferred_element_type=jnp.float32)

    @pl.when(j == pl.num_programs(1) - 1)
    def _():
        o_ref[...] = acc_ref[...].astype(o_ref.dtype)


# ----------------------------------------------------------------------------
# One-time weight preprocessing (do at init, NOT per forward call)
# ----------------------------------------------------------------------------
def prepare_gated_mlp_weights(w_fc, w_proj, *, ti, compute_dtype=jnp.bfloat16):
    """Pack PyTorch Linear weights for the kernel.

    w_fc:   (2*I, E)  `fc` weight (rows [0:I]=gate, [I:2I]=up, matching
                       chunk(2, dim=-1) of the fc output)
    w_proj: (E, I)    `proj` weight

    Returns:
      w_gu:     (n_i, E, 2*ti)  contiguous per-I-tile fused [gate | up] blocks
      w_proj_t: (n_i*ti, E)     transposed (zero-padded) proj weight
    """
    I2, E = w_fc.shape
    I = I2 // 2
    I_pad = _round_up(I, ti)
    n_i = I_pad // ti

    w_gate = jnp.transpose(w_fc[:I, :]).astype(compute_dtype)   # (E, I)
    w_up = jnp.transpose(w_fc[I:, :]).astype(compute_dtype)     # (E, I)
    w_proj_t = jnp.transpose(w_proj).astype(compute_dtype)      # (I, E)

    if I_pad != I:
        pad = I_pad - I
        w_gate = jnp.pad(w_gate, ((0, 0), (0, pad)))
        w_up = jnp.pad(w_up, ((0, 0), (0, pad)))
        w_proj_t = jnp.pad(w_proj_t, ((0, pad), (0, 0)))

    # Block j = [gate[:, j*ti:(j+1)*ti] | up[:, j*ti:(j+1)*ti]] packed as a
    # contiguous (E, 2*ti) slab -> one full-burst DMA stream per I tile.
    w_gu = jnp.concatenate(
        [w_gate.reshape(E, n_i, ti), w_up.reshape(E, n_i, ti)], axis=-1
    )                                        # (E, n_i, 2*ti)
    w_gu = jnp.transpose(w_gu, (1, 0, 2))    # (n_i, E, 2*ti), contiguous per tile
    return w_gu, w_proj_t


# ----------------------------------------------------------------------------
# Forward
# ----------------------------------------------------------------------------
def gated_mlp_forward(x, w_gu, w_proj_t, *, ti, tm=None, compute_dtype=None,
                      vmem_limit_bytes=None):
    """x: (..., E); weights pre-packed with prepare_gated_mlp_weights."""
    orig_shape = x.shape
    E = orig_shape[-1]
    n_i, E_w, ti2 = w_gu.shape
    assert E_w == E and ti2 == 2 * ti and ti % 128 == 0
    I_pad, E2 = w_proj_t.shape
    assert E2 == E and I_pad == n_i * ti

    out_dtype = x.dtype
    if compute_dtype is None:
        compute_dtype = w_gu.dtype

    defaults = _tpu_defaults()
    vmem_cap = defaults["vmem_cap"]
    single_buffer_x = defaults["single_buffer_x"]
    if tm is None:
        tm = defaults["tm"]

    x2d = x.reshape(-1, E).astype(compute_dtype)
    M = x2d.shape[0]

    c_bytes = jnp.dtype(compute_dtype).itemsize
    o_bytes = jnp.dtype(out_dtype).itemsize
    # Sublane alignment: 8 rows for 4-byte dtypes, 16 for 2-byte (bf16).
    sublane = 16 if c_bytes == 2 else 8

    M_al = _round_up(M, sublane)
    n_m = max(1, _cdiv(M_al, tm))
    # v7x megacore: with a single M tile one TensorCore sits idle -> 2-way split.
    if n_m == 1 and M_al >= 2 * sublane:
        n_m = 2
    tm_eff = _round_up(_cdiv(M_al, n_m), sublane)

    # VMEM working set for a given tm (double-buffered weight/output streams,
    # single-buffered x when requested, resident f32 acc, in-kernel temps).
    def working_set(tm_):
        x_b = tm_ * E * c_bytes * (1 if single_buffer_x else 2)
        wgu = E * 2 * ti * c_bytes * 2
        wpr = ti * E * c_bytes * 2
        out = tm_ * E * o_bytes * 2
        acc = tm_ * E * 4
        tmp = tm_ * 2 * ti * 4 + tm_ * ti * 4     # h (f32) + gated temp headroom
        return x_b + wgu + wpr + out + acc + tmp

    budget = int(0.85 * vmem_cap)
    while tm_eff > sublane and working_set(tm_eff) > budget:
        tm_eff = _round_up(tm_eff // 2, sublane)

    M_pad = _round_up(M, tm_eff)
    if M_pad != M:
        x2d = jnp.pad(x2d, ((0, M_pad - M), (0, 0)))

    if vmem_limit_bytes is None:
        vmem_limit_bytes = int(working_set(tm_eff) * 1.25) + (8 << 20)
        vmem_limit_bytes = max(vmem_limit_bytes, 32 << 20)
        vmem_limit_bytes = min(vmem_limit_bytes, budget)

    grid = (M_pad // tm_eff, n_i)

    def build_call(x_buffers):
        if x_buffers == 1:
            # x block index is constant along the inner j axis -> single buffer.
            x_spec = pl.BlockSpec((tm_eff, E), lambda i, j: (i, 0),
                                  pipeline_mode=pl.Buffered(1))
        else:
            x_spec = pl.BlockSpec((tm_eff, E), lambda i, j: (i, 0))
        return pl.pallas_call(
            _gated_mlp_kernel,
            out_shape=jax.ShapeDtypeStruct((M_pad, E), out_dtype),
            grid_spec=pltpu.PrefetchScalarGridSpec(
                num_scalar_prefetch=0,
                grid=grid,
                in_specs=[
                    x_spec,
                    # Squeezed leading tile dim -> kernel sees (E, 2*ti);
                    # each block is a fully contiguous HBM slab.
                    pl.BlockSpec((None, E, 2 * ti), lambda i, j: (j, 0, 0)),
                    pl.BlockSpec((ti, E), lambda i, j: (j, 0)),
                ],
                out_specs=pl.BlockSpec((tm_eff, E), lambda i, j: (i, 0)),
                scratch_shapes=[pltpu.VMEM((tm_eff, E), jnp.float32)],
            ),
            compiler_params=pltpu.CompilerParams(
                dimension_semantics=("parallel", "arbitrary"),
                vmem_limit_bytes=vmem_limit_bytes,
            ),
        )

    if single_buffer_x:
        try:
            out = build_call(1)(x2d, w_gu, w_proj_t)
        except Exception:
            # Fallback for JAX versions / configs that reject pipeline_mode.
            out = build_call(2)(x2d, w_gu, w_proj_t)
    else:
        out = build_call(2)(x2d, w_gu, w_proj_t)

    if M_pad != M:
        out = out[:M]
    return out.reshape(orig_shape)


def gated_mlp(x, w_fc, w_proj, *, tm=None, ti=None, compute_dtype=jnp.bfloat16):
    """Convenience wrapper: packs weights then runs the kernel.

    In a real model call prepare_gated_mlp_weights() once at load time and
    reuse (w_gu, w_proj_t) across forward calls.  compute_dtype defaults to
    bf16 (the fast MXU path with f32 accumulation); pass jnp.float32 for
    exact-precision runs.
    """
    I = w_fc.shape[0] // 2
    if ti is None:
        ti = _pick_ti(I, _tpu_defaults()["ti_cap"])
    w_gu, w_proj_t = prepare_gated_mlp_weights(
        w_fc, w_proj, ti=ti, compute_dtype=compute_dtype)
    return gated_mlp_forward(x, w_gu, w_proj_t, ti=ti, tm=tm,
                             compute_dtype=compute_dtype)


def reference(x, w_fc, w_proj):
    h = jnp.einsum("...e,oe->...o", x, w_fc)
    I = w_fc.shape[0] // 2
    x1, x2 = h[..., :I], h[..., I:]
    g = (x1 * jax.nn.sigmoid(x1)) * x2
    return jnp.einsum("...i,ei->...e", g, w_proj)


if __name__ == "__main__":
    # Small config: batch=2, seq=8, n_embd=32, intermediate_size=64
    batch, seq, n_embd, inter = 2, 8, 32, 64

    key = jax.random.PRNGKey(0)
    kx, kf, kp = jax.random.split(key, 3)

    x = jax.random.normal(kx, (batch, seq, n_embd), dtype=jnp.float32)
    # PyTorch Linear layouts: (out_features, in_features)
    w_fc = jax.random.normal(kf, (2 * inter, n_embd), dtype=jnp.float32) * 0.02
    w_proj = jax.random.normal(kp, (n_embd, inter), dtype=jnp.float32) * 0.02

    y_ref = reference(x, w_fc, w_proj)

    # --- f32 path: exact check against the pure-JAX reference --------------
    y = jax.block_until_ready(gated_mlp(x, w_fc, w_proj, compute_dtype=jnp.float32))
    assert y.shape == (batch, seq, n_embd)
    assert jnp.allclose(y, y_ref, atol=1e-5, rtol=1e-5)

    # --- ragged token count: exercises the M-padding path -------------------
    x_odd = jax.random.normal(kx, (1, 5, n_embd), dtype=jnp.float32)
    y_odd = jax.block_until_ready(
        gated_mlp(x_odd, w_fc, w_proj, compute_dtype=jnp.float32))
    assert jnp.allclose(y_odd, reference(x_odd, w_fc, w_proj),
                        atol=1e-5, rtol=1e-5)

    # --- default fast path: bf16 compute, f32 I/O, looser tolerance ---------
    y_fast = jax.block_until_ready(gated_mlp(x, w_fc, w_proj))
    assert y_fast.dtype == x.dtype
    assert jnp.allclose(y_fast, y_ref, atol=1e-3, rtol=5e-2)

    # --- full-bf16 path: native-MXU dtype -----------------------------------
    xb = x.astype(jnp.bfloat16)
    y_bf = jax.block_until_ready(
        gated_mlp(xb, w_fc.astype(jnp.bfloat16), w_proj.astype(jnp.bfloat16)))
    assert y_bf.dtype == jnp.bfloat16
    assert jnp.allclose(y_bf.astype(jnp.float32), y_ref, atol=1e-3, rtol=5e-2)

    # --- multi-tile grid: exercises the accumulator across n_i > 1 ----------
    E2, I2b, M2 = 64, 320, 48
    xk, fk, pk = jax.random.split(jax.random.PRNGKey(1), 3)
    x2 = jax.random.normal(xk, (M2, E2), dtype=jnp.float32)
    w_fc2 = jax.random.normal(fk, (2 * I2b, E2), dtype=jnp.float32) * 0.02
    w_proj2 = jax.random.normal(pk, (E2, I2b), dtype=jnp.float32) * 0.02
    y2 = jax.block_until_ready(
        gated_mlp(x2, w_fc2, w_proj2, tm=16, ti=128, compute_dtype=jnp.float32))
    assert jnp.allclose(y2, reference(x2, w_fc2, w_proj2), atol=1e-5, rtol=1e-5)

    print("KERNEL_OK")
</pallas_src>

<mosaic_0001>
module attributes {stable_mosaic.version = 11 : i64} {
  func.func @_gated_mlp_kernel(%arg0: i32, %arg1: i32, %arg2: memref<8x32xf32, #tpu.memory_space<vmem>>, %arg3: memref<1x32x256xf32, #tpu.memory_space<vmem>>, %arg4: memref<128x32xf32, #tpu.memory_space<vmem>>, %arg5: memref<8x32xf32, #tpu.memory_space<vmem>>, %arg6: memref<8x32xf32, #tpu.memory_space<vmem>>) attributes {dimension_semantics = [#tpu.dimension_semantics<parallel>, #tpu.dimension_semantics<arbitrary>], iteration_bounds = array<i64: 2, 1>, scalar_prefetch = 0 : i64, scratch_operands = 1 : i64, tpu.core_type = #tpu.core_type<tc>, window_params = [{transform_indices = @transform_0, window_bounds = array<i64: 8, 32>}, {transform_indices = @transform_1, window_bounds = array<i64: 1, 32, 256>}, {transform_indices = @transform_2, window_bounds = array<i64: 128, 32>}, {transform_indices = @transform_3, window_bounds = array<i64: 8, 32>}]} {
    %c0_i32 = arith.constant 0 : i32
    %0 = arith.cmpi eq, %arg1, %c0_i32 : i32
    %1 = arith.extui %0 : i1 to i32
    %c0_i32_0 = arith.constant 0 : i32
    %2 = arith.cmpi ne, %1, %c0_i32_0 : i32
    scf.if %2 {
      %cst_15 = arith.constant 0.000000e+00 : f32
      %24 = vector.broadcast %cst_15 : f32 to vector<8x32xf32>
      %c0_16 = arith.constant 0 : index
      %c0_17 = arith.constant 0 : index
      %25 = vector.load %arg6[%c0_16, %c0_17] : memref<8x32xf32, #tpu.memory_space<vmem>>, vector<8x32xf32>
      tpu.vector_store %arg6[%c0_16, %c0_17], %24 {strides = array<i32>} : memref<8x32xf32, #tpu.memory_space<vmem>>, vector<8x32xf32>,
    } else {
    }
    %c0 = arith.constant 0 : index
    %c0_1 = arith.constant 0 : index
    %3 = vector.load %arg2[%c0, %c0_1] : memref<8x32xf32, #tpu.memory_space<vmem>>, vector<8x32xf32>
    %c0_2 = arith.constant 0 : index
    %c0_3 = arith.constant 0 : index
    %c0_4 = arith.constant 0 : index
    %4 = vector.load %arg3[%c0_2, %c0_3, %c0_4] : memref<1x32x256xf32, #tpu.memory_space<vmem>>, vector<1x32x256xf32>
    %5 = vector.shape_cast %4 : vector<1x32x256xf32> to vector<32x256xf32>
    %cst = arith.constant dense<0.000000e+00> : vector<8x256xf32>
    %6 = tpu.matmul %3, %5, %cst {dimension_numbers = #tpu.dot_dimension_numbers<[1], [0], [0], [1], [0, 0, 1, 1], [], []>} : vector<8x32xf32>, vector<32x256xf32>, vector<8x256xf32> -> vector<8x256xf32>
    %7 = vector.extract_strided_slice %6 {offsets = [0, 0], sizes = [8, 128], strides = [1, 1]} : vector<8x256xf32> to vector<8x128xf32>
    %8 = vector.extract_strided_slice %6 {offsets = [0, 128], sizes = [8, 128], strides = [1, 1]} : vector<8x256xf32> to vector<8x128xf32>
    %9 = arith.negf %7 : vector<8x128xf32>
    %10 = math.exp %9 : vector<8x128xf32>
    %cst_5 = arith.constant 1.000000e+00 : f32
    %11 = vector.broadcast %cst_5 : f32 to vector<8x128xf32>
    %12 = arith.addf %11, %10 : vector<8x128xf32>
    %13 = arith.divf %11, %12 : vector<8x128xf32>
    %14 = arith.mulf %7, %13 : vector<8x128xf32>
    %15 = arith.mulf %14, %8 : vector<8x128xf32>
    %c0_6 = arith.constant 0 : index
    %c0_7 = arith.constant 0 : index
    %16 = vector.load %arg6[%c0_6, %c0_7] : memref<8x32xf32, #tpu.memory_space<vmem>>, vector<8x32xf32>
    %c0_8 = arith.constant 0 : index
    %c0_9 = arith.constant 0 : index
    %17 = vector.load %arg4[%c0_8, %c0_9] : memref<128x32xf32, #tpu.memory_space<vmem>>, vector<128x32xf32>
    %cst_10 = arith.constant dense<0.000000e+00> : vector<8x32xf32>
    %18 = tpu.matmul %15, %17, %cst_10 {dimension_numbers = #tpu.dot_dimension_numbers<[1], [0], [0], [1], [0, 0, 1, 1], [], []>} : vector<8x128xf32>, vector<128x32xf32>, vector<8x32xf32> -> vector<8x32xf32>
    %19 = arith.addf %16, %18 : vector<8x32xf32>
    %c0_11 = arith.constant 0 : index
    %c0_12 = arith.constant 0 : index
    %20 = vector.load %arg6[%c0_11, %c0_12] : memref<8x32xf32, #tpu.memory_space<vmem>>, vector<8x32xf32>
    tpu.vector_store %arg6[%c0_11, %c0_12], %19 {strides = array<i32>} : memref<8x32xf32, #tpu.memory_space<vmem>>, vector<8x32xf32>,
    %c0_i32_13 = arith.constant 0 : i32
    %21 = arith.cmpi eq, %arg1, %c0_i32_13 : i32
    %22 = arith.extui %21 : i1 to i32
    %c0_i32_14 = arith.constant 0 : i32
    %23 = arith.cmpi ne, %22, %c0_i32_14 : i32
    scf.if %23 {
      %c0_15 = arith.constant 0 : index
      %c0_16 = arith.constant 0 : index
      %24 = vector.load %arg6[%c0_15, %c0_16] : memref<8x32xf32, #tpu.memory_space<vmem>>, vector<8x32xf32>
      %c0_17 = arith.constant 0 : index
      %c0_18 = arith.constant 0 : index
      %25 = vector.load %arg5[%c0_17, %c0_18] : memref<8x32xf32, #tpu.memory_space<vmem>>, vector<8x32xf32>
      tpu.vector_store %arg5[%c0_17, %c0_18], %24 {strides = array<i32>} : memref<8x32xf32, #tpu.memory_space<vmem>>, vector<8x32xf32>,
    } else {
    }
    return
  }
  func.func @transform_0(%arg0: i32, %arg1: i32) -> (i32, i32) {
    %c0_i32 = arith.constant 0 : i32
    %c0_i32_0 = arith.constant 0 : i32
    return %arg0, %c0_i32 : i32, i32
  }
  func.func @transform_1(%arg0: i32, %arg1: i32) -> (i32, i32, i32) {
    %c0_i32 = arith.constant 0 : i32
    %c0_i32_0 = arith.constant 0 : i32
    %c0_i32_1 = arith.constant 0 : i32
    return %arg1, %c0_i32, %c0_i32_0 : i32, i32, i32
  }
  func.func @transform_2(%arg0: i32, %arg1: i32) -> (i32, i32) {
    %c0_i32 = arith.constant 0 : i32
    %c0_i32_0 = arith.constant 0 : i32
    return %arg1, %c0_i32 : i32, i32
  }
  func.func @transform_3(%arg0: i32, %arg1: i32) -> (i32, i32) {
    %c0_i32 = arith.constant 0 : i32
    %c0_i32_0 = arith.constant 0 : i32
    return %arg0, %c0_i32 : i32, i32
  }
}

</mosaic_0001>

<bundles_post_ra>
// kernel: tpu_custom_call.1
= control target key start
LH: loop header
LB: loop body
LE: loop exit
PB: predicated region body
PF: predicated region fallthrough
CT: control target
= control target key end

     0   :  { %8 = vsyncpa [#allocation4], 0  ;;  %s952_s0 = inlined_call_operand.vmem [shape: f32[16,32], index: 0, kind: input, shape index: {}]   ;;  %s953_s1 = inlined_call_operand.vmem [shape: f32[1,32,256], index: 1, kind: input, shape index: {}]   ;;  %s954_s2 = inlined_call_operand.vmem [shape: f32[128,32], index: 2, kind: input, shape index: {}]   ;;  %s955_s3 = inlined_call_operand.hbm [shape: f32[16,32], index: 3, kind: output, shape index: {}]  }
   0x1   :  { %10 = vsyncpa [#allocation4 + $0x1], 0  ;;  %s752_s12 = smov 0   ;;  %s754_s13 = smov 0  }
   0x2   :  { %s756_s14 = smov 0   ;;  %s758_s15 = smov 0  }
   0x3   :  { %s760_s16 = smov 0   ;;  %s762_s17 = smov 0  }
   0x4 LB: > { %s523_s18 = sadd.s32 4294967295, %s727_s17   ;;  %s524_s19 = sadd.s32 4294967294, %s727_s17   ;;  %s727_s17 = sphi %s762_s17, %s16_s17   ;;  %s723_s16 = sphi %s760_s16, %s962_s16   ;;  %s719_s15 = sphi %s758_s15, %s961_s15   ;;  %s715_s14 = sphi %s756_s14, %s960_s14   ;;  %s711_s13 = sphi %s754_s13, %s959_s13   ;;  %s707_s12 = sphi %s752_s12, %s958_s12  }
   0x5   : > { %s28_s20 = sadd.s32 1, %s723_s16  ;;  %s113_s21 = sadd.s32 1, %s715_s14 }
   0x6   : > { %p30_p0 = scmp.ge.s32.totalorder %s28_s20, 2  ;;  %p123_p1 = scmp.ne.s32.totalorder %s715_s14, %s711_s13 }
   0x7   : > { %p124_p2 = scmp.eq.s32.totalorder %s523_s18, 1  ;;  %p129_p3 = scmp.ne.s32.totalorder %s711_s13, %s707_s12 }
   0x8   : > { %s964_s20 = smov (%p30_p0, %s28_s20), 0  ;;  %p130_p5 = scmp.eq.s32.totalorder %s524_s19, 1 }
   0x9   : > { %p792_p4 = por %p124_p2, %p123_p1  ;;  %s110_s23 = ssub.s32 %s723_s16, %s964_s20 }
   0xa   : > { %p529_p6 = scmp.ge.s32.totalorder %s727_s17, 1  ;;  %p111_p7 = scmp.eq.s32.totalorder %s110_s23, 0 }
   0xb   : > { %p799_p8 = por %p130_p5, %p129_p3  ;;  %p172_p9 = scmp.lt.s32.totalorder %s727_s17, 3 }
   0xc   : > { %s805_s25 = scalar_select %p111_p7, %s715_s14, %s113_s21  }
   0xd   : > { %p173_p10 = pnand %p529_p6, %p172_p9 }
   0xe   : > { %p205_p11 = scmp.lt.s32.totalorder (!%p173_p10), %s719_s15, 1  ;;  %s202_s28 = sand.u32 (!%p173_p10), 1, %s711_s13  }
   0xf   : > { %176 = sbr.rel (%p173_p10) target bundleno = 474 (0x1da), region = 32  ;;  %s535_s30 = sshll.u32 (!%p173_p10), %s719_s15, 7 }
  0x10   : > { %s911_s8 = scalar_lea.hbm (!%p173_p10), %s955_s3, %s535_s30  ;;  %s731_s11 = smov (!%p173_p10), [#allocation3]  }
  0x11   : > { %s655_s18 = sshll.u32 (!%p173_p10), %s731_s11, 4  ;;  %s656_s18 = int_to_ptr.vmem [resolvable:$false] %s655_s18 }
  0x14   : > { %v234_v0 = vld [vmem:[%s953_s1 + $0x38] sm:$0xff]  ;;  %v233_v1 = vld [vmem:[%s953_s1 + $0x30] sm:$0xff]  ;;  %v232_v2 = vld [vmem:[%s953_s1 + $0x28] sm:$0xff]  ;;  %vm224_vm0 = vcmask 261120   ;;  %v729_v4 = vmov 0.0   ;;  %s206_s9 = scalar_select %p205_p11, %s719_s15, 1 }
  0x15   : > { %263 = vmatprep.subr.mxu0 %v234_v0  ;;  %v231_v3 = vld [vmem:[%s953_s1 + $0x20] sm:$0xff]  ;;  %303 = vmatprep.mubr.f32.mxu0 %v729_v4  ;;  %225 = vst.msk [vmem:[#allocation2] sm:$0xff] %vm224_vm0, %v729_v4  ;;  %v230_v5 = vld [vmem:[%s953_s1 + $0x18] sm:$0xff]  ;;  %v229_v6 = vld [vmem:[%s953_s1 + $0x10] sm:$0xff]  ;;  %vm730_vm1 = vmmov 0   ;;  %s657_s15 = scalar_lea.vmem %s656_s18, 256 }
  0x16   : > { %264 = vmatpush1.msra.mxu0 %v233_v1  ;;  %555 = vmatprep.subr.mxu1 %v729_v4  ;;  %v228_v7 = vld [vmem:[%s953_s1 + $0x8] sm:$0xff]  ;;  %s531_s21 = sshll.u32 %s206_s9, 3  ;;  %v227_v8 = vld [vmem:[%s953_s1] sm:$0xff]  ;;  %v334_v10 = vld [vmem:[%s954_s2 + $0x78] sm:$0xff]  ;;  %s413_s9 = scalar_lea.sflag [#allocation4], %s202_s28 }
  0x17   : > { %265 = vmatprep.subr.mxu0 %v232_v2  ;;  %s208_s29 = scalar_lea.vmem %s952_s0, %s531_s21  ;;  %556 = vmatpush3.msra.mxu1 %v334_v10  ;;  %v333_v11 = vld [vmem:[%s954_s2 + $0x70] sm:$0xff]  ;;  %v332_v12 = vld [vmem:[%s954_s2 + $0x68] sm:$0xff]  ;;  %v331_v13 = vld [vmem:[%s954_s2 + $0x60] sm:$0xff] }
  0x18   : > { %266 = vmatpush1.msra.mxu0 %v231_v3  ;;  %v226_v9 = vld [vmem:[%s208_s29] sm:$0xff]  ;;  %557 = vmatprep.subr.mxu1 %v729_v4  ;;  %v330_v14 = vld [vmem:[%s954_s2 + $0x58] sm:$0xff]  ;;  %v329_v15 = vld [vmem:[%s954_s2 + $0x50] sm:$0xff]  ;;  %s530_s29 = sshll.u32 %s202_s28, 3 }
  0x19   : > { %267 = vmatprep.subr.mxu0 %v230_v5  ;;  %558 = vmatpush3.msra.mxu1 %v333_v11  ;;  %v328_v16 = vld [vmem:[%s954_s2 + $0x48] sm:$0xff]  ;;  %v327_v17 = vld [vmem:[%s954_s2 + $0x40] sm:$0xff]  ;;  %v326_v18 = vld [vmem:[%s954_s2 + $0x38] sm:$0xff]  ;;  %s204_s4 = scalar_lea.vmem [#allocation3], %s530_s29 }
  0x1a   : > { %268 = vmatpush1.msra.mxu0 %v229_v6  ;;  %559 = vmatprep.subr.mxu1 %v729_v4  ;;  %v325_v19 = vld [vmem:[%s954_s2 + $0x30] sm:$0xff]  ;;  %v324_v20 = vld [vmem:[%s954_s2 + $0x28] sm:$0xff]  ;;  %v323_v21 = vld [vmem:[%s954_s2 + $0x20] sm:$0xff]  ;;  %s426_s5 = sshll.u32 %s204_s4, 4  ;;  %s427_s5 = int_to_ptr.vmem [resolvable:$true] %s426_s5 }
  0x1b   : > { %269 = vmatprep.subr.mxu0 %v228_v7  ;;  %560 = vmatpush3.msra.mxu1 %v332_v12  ;;  %v322_v22 = vld [vmem:[%s954_s2 + $0x18] sm:$0xff]  ;;  %v321_v23 = vld [vmem:[%s954_s2 + $0x10] sm:$0xff]  ;;  %v320_v24 = vld [vmem:[%s954_s2 + $0x8] sm:$0xff]  ;;  %s651_s10 = scalar_lea.vmem %s427_s5, 128  ;;  %p658_p1 = scmp.lt.s32.totalorder %s427_s5, %s656_s18 }
  0x1c   : > { %270 = vmatpush1.msra.mxu0 %v227_v8  ;;  %561 = vmatprep.subr.mxu1 %v729_v4  ;;  %v319_v25 = vld [vmem:[%s954_s2] sm:$0xff]  ;;  %p652_p12 = scmp.ne.s32.totalorder %s427_s5, %s651_s10  ;;  %p659_p2 = scmp.lt.s32.totalorder %s657_s15, %s651_s10 }
  0x1d   : > { %532 = vmatmul.mubr.msk.f32.vlgmr.msra.gmra.mxu0 %vm224_vm0, %v226_v9  ;;  %562 = vmatpush3.msra.mxu1 %v331_v13  ;;  %v318_v34 = vld [vmem:[#allocation2] sm:$0xff] }
  0x1e   : > { %563 = vmatprep.subr.mxu1 %v729_v4  ;;  %587 = vmatprep.mubr.msk.f32.mxu1 %vm730_vm1, %v729_v4  ;;  %p653_p13 = pnand %p652_p12, %p792_p4  ;;  %p660_p3 = por %p659_p2, %p658_p1 }
  0x1f   : > { %564 = vmatpush3.msra.mxu1 %v330_v14 }
  0x20   : > { %565 = vmatprep.subr.mxu1 %v729_v4  ;;  %p654_p0 = pneg %p653_p13 }
  0x21   : > { %566 = vmatpush3.msra.mxu1 %v329_v15 }
  0x22   : > { %567 = vmatprep.subr.mxu1 %v729_v4  ;;  %p661_p5 = pnand %p660_p3, %p654_p0 }
  0x23   : > { %568 = vmatpush3.msra.mxu1 %v328_v16 }
  0x24   : > { %569 = vmatprep.subr.mxu1 %v729_v4 }
  0x25   : > { %570 = vmatpush3.msra.mxu1 %v327_v17 }
  0x26   : > { %571 = vmatprep.subr.mxu1 %v729_v4 }
  0x27   : > { %572 = vmatpush3.msra.mxu1 %v326_v18 }
  0x28   : > { %573 = vmatprep.subr.mxu1 %v729_v4 }
  0x29   : > { %574 = vmatpush3.msra.mxu1 %v325_v19 }
  0x2a   : > { %575 = vmatprep.subr.mxu1 %v729_v4 }
  0x2b   : > { %576 = vmatpush3.msra.mxu1 %v324_v20 }
  0x2c   : > { %577 = vmatprep.subr.mxu1 %v729_v4 }
  0x2d   : > { %578 = vmatpush3.msra.mxu1 %v323_v21 }
  0x2e   : > { %579 = vmatprep.subr.mxu1 %v729_v4 }
  0x2f   : > { %580 = vmatpush3.msra.mxu1 %v322_v22 }
  0x30   : > { %581 = vmatprep.subr.mxu1 %v729_v4 }
  0x31   : > { %582 = vmatpush3.msra.mxu1 %v321_v23 }
  0x32   : > { %583 = vmatprep.subr.mxu1 %v729_v4 }
  0x33   : > { %584 = vmatpush3.msra.mxu1 %v320_v24 }
  0x34   : > { %585 = vmatprep.subr.mxu1 %v729_v4 }
  0x35   : > { %586 = vmatpush3.msra.mxu1 %v319_v25 }
  0xdd   : > { %v305_v26 = vpop.f32.mrf.mxu0 }
  0xde   : > { %v533_v27 = vmul.f32 -1.442695, %v305_v26 }
  0xdf   : > { %v307_v32 = vpop.f32.mrf.mxu0 }
  0xe0   : > { %647 = vpow2.f32 %v533_v27 }
  0xed   : > { %v648_v28 = vpop.eup %647 }
  0xee   : > { %v313_v29 = vadd.f32 1.0, %v648_v28 }
  0xf0   : > { %649 = vrcp.f32 %v313_v29 }
  0xfd   : > { %v650_v30 = vpop.eup %649 }
  0xfe   : > { %v316_v31 = vmul.f32 %v650_v30, %v305_v26 }
 0x100   : > { %v317_v33 = vmul.f32 %v316_v31, %v307_v32 }
 0x102   : > { %588 = vmatmul.mubr.f32.vlgmr.msra.gmra.mxu1 %v317_v33 }
 0x1c2   : > { %v401_v35 = vpop.f32.mrf.mxu1 }
 0x1c3   : > { %v405_v36 = vadd.f32 %v401_v35, %v318_v34 }
 0x1c4   : > { %v589_v37 = vpop.f32.mrf.mxu1 }
 0x1c5   : > { %406 = vst.msk [vmem:[#allocation2] sm:$0xff] %vm224_vm0, %v405_v36 }
 0x1cc   : > { %v410_v38 = vld [vmem:[#allocation2] sm:$0xff] }
 0x1cd   : > { %411 = vst.msk [vmem:[%s204_s4] sm:$0xff] %vm224_vm0, %v410_v38 }
 0x1ce   : > { %664 = shalt.err (!%p661_p5)
}
 0x1cf   : > { %s665_s19 = scalar_lea.hbm %s911_s8, 128  ;;  %s669_s26 = scalar_lea.hbm %s955_s3, 256 }
 0x1d0   : > { %p666_p6 = scmp.ne.s32.totalorder %s911_s8, %s665_s19  ;;  %p670_p10 = scmp.lt.s32.totalorder %s911_s8, %s955_s3 }
 0x1d1   : > { %p671_p11 = scmp.lt.s32.totalorder %s669_s26, %s665_s19 }
 0x1d2   : > { %p667_p7 = pnand %p666_p6, %p792_p4 }
 0x1d3   : > { %p672_p12 = por %p671_p11, %p670_p10 }
 0x1d4   : > { %p668_p9 = pneg %p667_p7 }
 0x1d6   : > { %p673_p13 = pnand %p672_p12, %p668_p9 }
 0x1d8   : > { %676 = shalt.err (!%p673_p13)
}
 0x1d9   : > { %590 = dma.vmem_to_hbm [thread:$0]  (%p792_p4), %s427_s5, 128, %s911_s8, %s413_s9  }
 0x1da PF: > { %p596_p0 = scmp.ge.s32.totalorder %s727_s17, 2  ;;  %s438_s29 = sand.u32 1, %s707_s12  }
 0x1db   : > { %s439_s30 = scalar_lea.sflag [#allocation4], %s438_s29 }
 0x1dc   : > { %p593_p1 = pnand %p596_p0, %p799_p8 }
 0x1de   : > { %p594_p2 = pneg %p593_p1 }
 0x1e0   : > { %702 = dma.done.wait (%p594_p2), %s439_s30, 128  }
 0x1e1   : > { %704 = vsyncadd (%p594_p2), %s439_s30, 4294967168  ;;  %s16_s17 = sadd.s32 1, %s727_s17   ;;  %s958_s12 = smov %s711_s13 }
 0x1e2   : > { %p13_p3 = scmp.ge.s32.totalorder %s16_s17, 4   ;;  %s959_s13 = smov %s715_s14 }
 0x1e3   : > { %s960_s14 = smov %s805_s25  ;;  %s961_s15 = smov %s723_s16 }
 0x1e4   : > { %s962_s16 = smov %s964_s20  ;;  %15 = sbr.rel (!%p13_p3) target bundleno = 4 (0x4), region = 81 }
 0x1e9   :  { %444 = vsyncpa [#allocation4], 1 }
 0x1ea   :  { %446 = vsyncpa [#allocation4 + $0x1], 1 }

</bundles_post_ra>
